<compile_context>
chip_gen: v6e
topology: v6e:2x2x1
jax: 0.10.0
libtpu: 0.0.40
codegen_flags: <defaults>
</compile_context>

<pallas_src>
import functools
import math

import jax
import jax.numpy as jnp
from jax import lax
from jax.experimental import pallas as pl
from jax.experimental.pallas import tpu as pltpu


def _round_up(x, m):
    return (x + m - 1) // m * m


# --------------------------------------------------------------------------- #
# Kernel 1: fused QKV projection                                               #
# --------------------------------------------------------------------------- #
def _qkv_proj_kernel(x_ref, w_ref, b_ref, q_ref, k_ref, v_ref):
    hp = x_ref.shape[-1]
    x = x_ref[0]                                   # (row_tile, Hp)  bf16
    w = w_ref[...]                                 # (Hp, 3*Hp)      bf16
    b = b_ref[...]                                 # (1, 3*Hp)       f32
    qkv = jnp.dot(x, w, preferred_element_type=jnp.float32) + b
    # Hp is a multiple of 128 -> slices sit on lane-tile boundaries (free views).
    q_ref[0] = qkv[:, 0 * hp:1 * hp].astype(q_ref.dtype)
    k_ref[0] = qkv[:, 1 * hp:2 * hp].astype(k_ref.dtype)
    v_ref[0] = qkv[:, 2 * hp:3 * hp].astype(v_ref.dtype)


# --------------------------------------------------------------------------- #
# Kernel 2: flash attention (online softmax)                                   #
# --------------------------------------------------------------------------- #
def _flash_attn_kernel(q_ref, k_ref, v_ref, o_ref, m_sc, l_sc, acc_sc, *,
                       s_real, need_kv_mask):
    ki = pl.program_id(2)

    @pl.when(ki == 0)
    def _init():
        m_sc[...] = jnp.full(m_sc.shape, -jnp.inf, m_sc.dtype)
        l_sc[...] = jnp.zeros(l_sc.shape, l_sc.dtype)
        acc_sc[...] = jnp.zeros(acc_sc.shape, acc_sc.dtype)

    q = q_ref[0]                                   # (q_tile, Hp)   bf16
    k = k_ref[0]                                   # (kv_tile, Hp)  bf16
    v = v_ref[0]                                   # (kv_tile, Hp)  bf16

    # Q @ K^T via last-dim contraction (MXU-native, no transpose); f32 accumulation.
    s = jnp.einsum("qh,kh->qk", q, k, preferred_element_type=jnp.float32)

    if need_kv_mask:
        # Mask padded kv columns so they cannot contaminate max/sum.
        kv_tile = k.shape[0]
        col = ki * kv_tile + lax.broadcasted_iota(jnp.int32, (1, kv_tile), 1)
        s = jnp.where(col < s_real, s, -1e30)

    m_prev = m_sc[...]                             # (q_tile, 1)
    m_new = jnp.maximum(m_prev, jnp.max(s, axis=-1, keepdims=True))
    alpha = jnp.exp(m_prev - m_new)                # EUP exp
    e = jnp.exp(s - m_new)                         # (q_tile, kv_tile), masked -> 0

    l_sc[...] = alpha * l_sc[...] + jnp.sum(e, axis=-1, keepdims=True)
    acc_sc[...] = alpha * acc_sc[...] + jnp.dot(
        e.astype(v.dtype), v, preferred_element_type=jnp.float32)
    m_sc[...] = m_new

    @pl.when(ki == pl.num_programs(2) - 1)
    def _finalize():
        # Deferred softmax normalization on the (q_tile, Hp) accumulator only.
        # Exact reciprocal here (runs once per q tile) for accuracy.
        inv_l = pl.reciprocal(l_sc[...], approx=False)
        o_ref[0] = (acc_sc[...] * inv_l).astype(o_ref.dtype)


# --------------------------------------------------------------------------- #
# Wrapper                                                                      #
# --------------------------------------------------------------------------- #
def attention_pallas(x, wk, wq, wv, bk, bq, bv):
    """x: (B, S, H) f32.  wk/wq/wv: (H, H) torch layout (out, in).  b*: (H,)."""
    B, S, H = x.shape
    scale = 1.0 / math.sqrt(float(H))

    # Lane-dense hidden dim (zero padding contributes 0 to QK^T and A@V).
    Hp = _round_up(max(H, 128), 128)

    # Tile sizes: one tile for tiny S; 256/512 multiples for large S.
    if S <= 256:
        q_tile = kv_tile = _round_up(S, 8)
        Sp = q_tile
    else:
        q_tile, kv_tile = 256, 512
        Sp = _round_up(S, 512)                     # multiple of both tiles

    n_q = Sp // q_tile
    n_kv = Sp // kv_tile

    # ---- wrapper-side layout plumbing (outside the kernels) ----------------
    x_p = jnp.zeros((B, Sp, Hp), jnp.bfloat16).at[:, :S, :H].set(
        x.astype(jnp.bfloat16))

    def pad_w(w, s=1.0):
        # torch (out,in) -> (in,out), scaled, zero-padded to (Hp, Hp).
        return jnp.zeros((Hp, Hp), jnp.float32).at[:H, :H].set(
            w.T.astype(jnp.float32) * s)

    def pad_b(b, s=1.0):
        return jnp.zeros((Hp,), jnp.float32).at[:H].set(b.astype(jnp.float32) * s)

    # Fused QKV weight/bias; softmax scale folded into the Q segment.
    w_fused = jnp.concatenate([pad_w(wq, scale), pad_w(wk), pad_w(wv)],
                              axis=1).astype(jnp.bfloat16)           # (Hp, 3*Hp)
    b_fused = jnp.concatenate([pad_b(bq, scale), pad_b(bk), pad_b(bv)]
                              ).reshape(1, 3 * Hp)                   # (1, 3*Hp)

    # ---- kernel 1: fused QKV projection -------------------------------------
    qkv_shape = jax.ShapeDtypeStruct((B, Sp, Hp), jnp.bfloat16)
    q, k, v = pl.pallas_call(
        _qkv_proj_kernel,
        out_shape=(qkv_shape, qkv_shape, qkv_shape),
        grid_spec=pltpu.PrefetchScalarGridSpec(
            num_scalar_prefetch=0,
            grid=(B, n_q),
            in_specs=[
                pl.BlockSpec((1, q_tile, Hp), lambda b, i: (b, i, 0)),
                pl.BlockSpec((Hp, 3 * Hp), lambda b, i: (0, 0)),
                pl.BlockSpec((1, 3 * Hp), lambda b, i: (0, 0)),
            ],
            out_specs=[pl.BlockSpec((1, q_tile, Hp), lambda b, i: (b, i, 0))
                       for _ in range(3)],
        ),
        compiler_params=pltpu.CompilerParams(
            dimension_semantics=("parallel", "parallel")),
    )(x_p, w_fused, b_fused)

    # ---- kernel 2: flash attention -------------------------------------------
    kernel = functools.partial(_flash_attn_kernel,
                               s_real=S, need_kv_mask=(Sp != S))
    out_p = pl.pallas_call(
        kernel,
        out_shape=jax.ShapeDtypeStruct((B, Sp, Hp), jnp.float32),
        grid_spec=pltpu.PrefetchScalarGridSpec(
            num_scalar_prefetch=0,
            grid=(B, n_q, n_kv),                   # kv (reduction) axis last
            in_specs=[
                pl.BlockSpec((1, q_tile, Hp), lambda b, qi, ki: (b, qi, 0)),
                pl.BlockSpec((1, kv_tile, Hp), lambda b, qi, ki: (b, ki, 0)),
                pl.BlockSpec((1, kv_tile, Hp), lambda b, qi, ki: (b, ki, 0)),
            ],
            out_specs=pl.BlockSpec((1, q_tile, Hp), lambda b, qi, ki: (b, qi, 0)),
            scratch_shapes=[
                pltpu.VMEM((q_tile, 1), jnp.float32),    # running max m
                pltpu.VMEM((q_tile, 1), jnp.float32),    # running sum l
                pltpu.VMEM((q_tile, Hp), jnp.float32),   # output accumulator
            ],
        ),
        compiler_params=pltpu.CompilerParams(
            dimension_semantics=("parallel", "parallel", "arbitrary")),
    )(q, k, v)

    return out_p[:, :S, :H].astype(x.dtype)


# --------------------------------------------------------------------------- #
# Pure-JAX reference                                                           #
# --------------------------------------------------------------------------- #
def attention_reference(x, wk, wq, wv, bk, bq, bv):
    k = jnp.einsum("bsh,oh->bso", x, wk) + bk
    q = jnp.einsum("bsh,oh->bso", x, wq) + bq
    v = jnp.einsum("bsh,oh->bso", x, wv) + bv
    scores = jnp.einsum("bqh,bkh->bqk", q, k) / jnp.sqrt(
        jnp.asarray(x.shape[-1], jnp.float32))
    attn = jax.nn.softmax(scores, axis=-1)
    return jnp.einsum("bqk,bkh->bqh", attn, v)


if __name__ == "__main__":
    B, S, H = 2, 8, 32
    key = jax.random.PRNGKey(0)
    kx, k1, k2, k3, k4, k5, k6 = jax.random.split(key, 7)

    x = jax.random.normal(kx, (B, S, H), dtype=jnp.float32)

    # Deterministic parameter init (mimics nn.Linear's uniform(-1/sqrt(H), 1/sqrt(H)))
    bound = 1.0 / math.sqrt(H)
    wk = jax.random.uniform(k1, (H, H), jnp.float32, -bound, bound)
    wq = jax.random.uniform(k2, (H, H), jnp.float32, -bound, bound)
    wv = jax.random.uniform(k3, (H, H), jnp.float32, -bound, bound)
    bk = jax.random.uniform(k4, (H,), jnp.float32, -bound, bound)
    bq = jax.random.uniform(k5, (H,), jnp.float32, -bound, bound)
    bv = jax.random.uniform(k6, (H,), jnp.float32, -bound, bound)

    out = attention_pallas(x, wk, wq, wv, bk, bq, bv)
    out = jax.block_until_ready(out)

    ref = attention_reference(x, wk, wq, wv, bk, bq, bv)
    assert out.shape == (B, S, H)
    # bf16 matmul inputs (f32 accumulation) -> loosened tolerance vs the f32 reference.
    assert jnp.allclose(out, ref, atol=5e-2, rtol=5e-2), "mismatch vs reference"

    print("KERNEL_OK")
</pallas_src>

<mosaic_0001>
module attributes {stable_mosaic.version = 11 : i64} {
  func.func @_qkv_proj_kernel(%arg0: i32, %arg1: i32, %arg2: memref<1x8x128xbf16, #tpu.memory_space<vmem>>, %arg3: memref<128x384xbf16, #tpu.memory_space<vmem>>, %arg4: memref<1x384xf32, #tpu.memory_space<vmem>>, %arg5: memref<1x8x128xbf16, #tpu.memory_space<vmem>>, %arg6: memref<1x8x128xbf16, #tpu.memory_space<vmem>>, %arg7: memref<1x8x128xbf16, #tpu.memory_space<vmem>>) attributes {dimension_semantics = [#tpu.dimension_semantics<parallel>, #tpu.dimension_semantics<parallel>], iteration_bounds = array<i64: 2, 1>, scalar_prefetch = 0 : i64, scratch_operands = 0 : i64, tpu.core_type = #tpu.core_type<tc>, window_params = [{transform_indices = @transform_0, window_bounds = array<i64: 1, 8, 128>}, {pipeline_mode = #tpu.pipeline_mode<synchronous>, transform_indices = @transform_1, window_bounds = array<i64: 128, 384>}, {pipeline_mode = #tpu.pipeline_mode<synchronous>, transform_indices = @transform_2, window_bounds = array<i64: 1, 384>}, {transform_indices = @transform_3, window_bounds = array<i64: 1, 8, 128>}, {transform_indices = @transform_4, window_bounds = array<i64: 1, 8, 128>}, {transform_indices = @transform_5, window_bounds = array<i64: 1, 8, 128>}]} {
    %c0 = arith.constant 0 : index
    %c0_0 = arith.constant 0 : index
    %c0_1 = arith.constant 0 : index
    %0 = vector.load %arg2[%c0, %c0_0, %c0_1] : memref<1x8x128xbf16, #tpu.memory_space<vmem>>, vector<1x8x128xbf16>
    %1 = vector.shape_cast %0 : vector<1x8x128xbf16> to vector<8x128xbf16>
    %c0_2 = arith.constant 0 : index
    %c0_3 = arith.constant 0 : index
    %2 = vector.load %arg3[%c0_2, %c0_3] : memref<128x384xbf16, #tpu.memory_space<vmem>>, vector<128x384xbf16>
    %c0_4 = arith.constant 0 : index
    %c0_5 = arith.constant 0 : index
    %3 = vector.load %arg4[%c0_4, %c0_5] : memref<1x384xf32, #tpu.memory_space<vmem>>, vector<1x384xf32>
    %cst = arith.constant dense<0.000000e+00> : vector<8x384xf32>
    %4 = tpu.matmul %1, %2, %cst {dimension_numbers = #tpu.dot_dimension_numbers<[1], [0], [0], [1], [0, 0, 1, 1], [], []>} : vector<8x128xbf16>, vector<128x384xbf16>, vector<8x384xf32> -> vector<8x384xf32>
    %5 = vector.broadcast %3 : vector<1x384xf32> to vector<8x384xf32>
    %6 = arith.addf %4, %5 : vector<8x384xf32>
    %7 = vector.extract_strided_slice %6 {offsets = [0, 0], sizes = [8, 128], strides = [1, 1]} : vector<8x384xf32> to vector<8x128xf32>
    %8 = arith.truncf %7 : vector<8x128xf32> to vector<8x128xbf16>
    %c0_6 = arith.constant 0 : index
    %c0_7 = arith.constant 0 : index
    %c0_8 = arith.constant 0 : index
    %9 = vector.load %arg5[%c0_6, %c0_7, %c0_8] : memref<1x8x128xbf16, #tpu.memory_space<vmem>>, vector<1x8x128xbf16>
    %10 = vector.shape_cast %9 : vector<1x8x128xbf16> to vector<8x128xbf16>
    %11 = vector.shape_cast %8 : vector<8x128xbf16> to vector<1x8x128xbf16>
    tpu.vector_store %arg5[%c0_6, %c0_7, %c0_8], %11 {strides = array<i32>} : memref<1x8x128xbf16, #tpu.memory_space<vmem>>, vector<1x8x128xbf16>,
    %12 = vector.extract_strided_slice %6 {offsets = [0, 128], sizes = [8, 128], strides = [1, 1]} : vector<8x384xf32> to vector<8x128xf32>
    %13 = arith.truncf %12 : vector<8x128xf32> to vector<8x128xbf16>
    %c0_9 = arith.constant 0 : index
    %c0_10 = arith.constant 0 : index
    %c0_11 = arith.constant 0 : index
    %14 = vector.load %arg6[%c0_9, %c0_10, %c0_11] : memref<1x8x128xbf16, #tpu.memory_space<vmem>>, vector<1x8x128xbf16>
    %15 = vector.shape_cast %14 : vector<1x8x128xbf16> to vector<8x128xbf16>
    %16 = vector.shape_cast %13 : vector<8x128xbf16> to vector<1x8x128xbf16>
    tpu.vector_store %arg6[%c0_9, %c0_10, %c0_11], %16 {strides = array<i32>} : memref<1x8x128xbf16, #tpu.memory_space<vmem>>, vector<1x8x128xbf16>,
    %17 = vector.extract_strided_slice %6 {offsets = [0, 256], sizes = [8, 128], strides = [1, 1]} : vector<8x384xf32> to vector<8x128xf32>
    %18 = arith.truncf %17 : vector<8x128xf32> to vector<8x128xbf16>
    %c0_12 = arith.constant 0 : index
    %c0_13 = arith.constant 0 : index
    %c0_14 = arith.constant 0 : index
    %19 = vector.load %arg7[%c0_12, %c0_13, %c0_14] : memref<1x8x128xbf16, #tpu.memory_space<vmem>>, vector<1x8x128xbf16>
    %20 = vector.shape_cast %19 : vector<1x8x128xbf16> to vector<8x128xbf16>
    %21 = vector.shape_cast %18 : vector<8x128xbf16> to vector<1x8x128xbf16>
    tpu.vector_store %arg7[%c0_12, %c0_13, %c0_14], %21 {strides = array<i32>} : memref<1x8x128xbf16, #tpu.memory_space<vmem>>, vector<1x8x128xbf16>,
    return
  }
  func.func @transform_0(%arg0: i32, %arg1: i32) -> (i32, i32, i32) {
    %c0_i32 = arith.constant 0 : i32
    %c0_i32_0 = arith.constant 0 : i32
    return %arg0, %arg1, %c0_i32 : i32, i32, i32
  }
  func.func @transform_1(%arg0: i32, %arg1: i32) -> (i32, i32) {
    %c0_i32 = arith.constant 0 : i32
    %c0_i32_0 = arith.constant 0 : i32
    %c0_i32_1 = arith.constant 0 : i32
    return %c0_i32, %c0_i32_0 : i32, i32
  }
  func.func @transform_2(%arg0: i32, %arg1: i32) -> (i32, i32) {
    %c0_i32 = arith.constant 0 : i32
    %c0_i32_0 = arith.constant 0 : i32
    %c0_i32_1 = arith.constant 0 : i32
    return %c0_i32, %c0_i32_0 : i32, i32
  }
  func.func @transform_3(%arg0: i32, %arg1: i32) -> (i32, i32, i32) {
    %c0_i32 = arith.constant 0 : i32
    %c0_i32_0 = arith.constant 0 : i32
    return %arg0, %arg1, %c0_i32 : i32, i32, i32
  }
  func.func @transform_4(%arg0: i32, %arg1: i32) -> (i32, i32, i32) {
    %c0_i32 = arith.constant 0 : i32
    %c0_i32_0 = arith.constant 0 : i32
    return %arg0, %arg1, %c0_i32 : i32, i32, i32
  }
  func.func @transform_5(%arg0: i32, %arg1: i32) -> (i32, i32, i32) {
    %c0_i32 = arith.constant 0 : i32
    %c0_i32_0 = arith.constant 0 : i32
    return %arg0, %arg1, %c0_i32 : i32, i32, i32
  }
}

</mosaic_0001>

<bundles_post_ra>
// kernel: tpu_custom_call.1
= control target key start
LH: loop header
LB: loop body
LE: loop exit
PB: predicated region body
PF: predicated region fallthrough
CT: control target
= control target key end

     0   :  { %s1451_s0 = inlined_call_operand.hbm [shape: bf16[2,8,128], index: 0, kind: input, shape index: {}]   ;;  %s1452_s1 = inlined_call_operand.hbm [shape: bf16[128,384], index: 1, kind: input, shape index: {}]   ;;  %s1453_s2 = inlined_call_operand.vmem [shape: f32[1,384], index: 2, kind: input, shape index: {}]   ;;  %s1454_s3 = inlined_call_operand.hbm [shape: bf16[2,8,128], index: 3, kind: output, shape index: {0}]   ;;  %s1455_s4 = inlined_call_operand.hbm [shape: bf16[2,8,128], index: 4, kind: output, shape index: {1}]   ;;  %s1456_s5 = inlined_call_operand.hbm [shape: bf16[2,8,128], index: 5, kind: output, shape index: {2}]  }
   0x1   :  { %1461 = sst [smem:[#allocation16_spill]] %s1452_s1 }
   0x2   :  { %11 = vsyncpa [#allocation3], 0 }
   0x3   :  { %13 = vsyncpa [#allocation3 + $0x1], 0 }
   0x4   :  { %14 = vsyncpa [#allocation6], 0 }
   0x5   :  { %15 = vsyncpa [#allocation4], 0 }
   0x6   :  { %17 = vsyncpa [#allocation4 + $0x1], 0 }
   0x7   :  { %18 = vsyncpa [#allocation9], 0 }
   0x8   :  { %20 = vsyncpa [#allocation9 + $0x1], 0  ;;  %s1196_s18 = smov 0   ;;  %s1198_s19 = smov 0  }
   0x9   :  { %s1200_s20 = smov 0   ;;  %s1202_s21 = smov 0  }
   0xa   :  { %s1204_s22 = smov 0   ;;  %s1206_s23 = smov 0  }
   0xb LB: > { %s1227_s24 = sadd.s32 4294967295, %s1154_s23   ;;  %s1457_s25 = sadd.s32 4294967294, %s1154_s23   ;;  %s1154_s23 = sphi %s1206_s23, %s26_s23   ;;  %s1150_s22 = sphi %s1204_s22, %s1484_s22   ;;  %s1146_s21 = sphi %s1202_s21, %s1483_s21   ;;  %s1142_s20 = sphi %s1200_s20, %s1482_s20   ;;  %s1138_s19 = sphi %s1198_s19, %s1481_s19   ;;  %s1134_s18 = sphi %s1196_s18, %s1480_s18  }
   0xc   : > { %p60_p0 = scmp.ne.s32.totalorder %s1138_s19, %s1134_s18  ;;  %p1459_p1 = scmp.eq.s32.totalorder %s1227_s24, 0 }
   0xd   : > { %p134_p3 = scmp.eq.s32.totalorder %s1457_s25, 1  ;;  %p768_p5 = scmp.ge.s32.totalorder %s1154_s23, 1 }
   0xe   : > { %p1238_p4 = por %p1459_p1, %p60_p0  ;;  %p197_p7 = scmp.lt.s32.totalorder %s1154_s23, 3 }
   0xf   : > { %p1243_p6 = por %p134_p3, %p60_p0  ;;  %s1156_s29 = smov [#allocation5]  }
  0x10   : > { %p1248_p8 = pnand %p768_p5, %p197_p7  ;;  %s209_s30 = sshll.u32 %s1156_s29, 4  ;;  %s210_s30 = int_to_ptr.vmem [resolvable:$true] %s209_s30 }
  0x11   : > { %s1463_s27 = scalar_select %p1243_p6, 1, 0 }
  0x12   : > { %p852_p9 = pneg %p1248_p8  ;;  %s38_s7 = sadd.s32 1, %s1150_s22 }
  0x13   : > { %s971_s8 = scalar_lea.vmem %s210_s30, 3072  ;;  %p979_p5 = scmp.lt.s32.totalorder %s210_s30, %s210_s30 }
  0x14   : > { %p1257_p11 = pnand %p852_p9, %p1459_p1  ;;  %p972_p13 = scmp.ne.s32.totalorder %s210_s30, %s971_s8 }
  0x15   : > { %p980_p7 = scmp.lt.s32.totalorder %s971_s8, %s971_s8 }
  0x16   : > { %p962_p12 = pneg %p1257_p11 }
  0x17   : > { %p981_p2 = por %p980_p7, %p979_p5 }
  0x18   : > { %p974_p0 = pnand %p972_p13, %p962_p12 }
  0x1a   : > { %p975_p3 = pneg %p974_p0 }
  0x1c   : > { %p982_p6 = pnand %p981_p2, %p975_p3 }
  0x1e   : > { %985 = shalt.err (!%p982_p6)
}
  0x1f   : > { %s1157_s9 = smov 192   ;;  %s1158_s10 = smov 12  }
  0x20   : > { %s1466_s1 = sld [smem:[#allocation16_spill]]  ;;  %p40_p2 = scmp.ge.s32.totalorder %s38_s7, 2 }
  0x21   : > { %s47_s13 = sadd.s32 1, %s1142_s20  ;;  %p54_p6 = scmp.ne.s32.totalorder %s1142_s20, %s1138_s19 }
  0x22   : > { %p55_p9 = scmp.eq.s32.totalorder %s1154_s23, 0  ;;  %s1486_s7 = smov (%p40_p2, %s38_s7), 0 }
  0x23   : > { %1467 = sst [smem:[#allocation15_spill]] %s1486_s7  ;;  %p1469_p13 = scmp.eq.s32.totalorder %s1227_s24, 1 }
  0x24   : > { %p1275_p12 = por %p55_p9, %p54_p6  ;;  %s42_s16 = ssub.s32 %s1150_s22, %s1486_s7 }
  0x25   : > { %p1281_p0 = por %p1469_p13, %p54_p6  ;;  %p871_p3 = scmp.lt.s32.totalorder %s1154_s23, 2 }
  0x26   : > { %855 = dma.hbm_to_vmem [thread:$0]  (!%p1257_p11), %s1466_s1, 3072, %s210_s30, [#allocation6], %s1157_s9, %s1157_s9, %s1158_s10  }
  0x27   : > { %p45_p11 = scmp.eq.s32.totalorder %s42_s16, 0  ;;  %s226_s17 = sand.u32 1, %s1142_s20  }
  0x28   : > { %s771_s29 = sshll.u32 %s226_s17, 2  ;;  %s772_s6 = sshll.u32 %s1150_s22, 6 }
  0x29   : > { %s1290_s30 = scalar_select %p45_p11, %s1142_s20, %s47_s13  }
  0x2a   : > { %s236_s10 = scalar_lea.hbm %s1451_s0, %s772_s6  ;;  %s230_s11 = scalar_lea.vmem [#allocation2], %s771_s29 }
  0x2b   : > { %s238_s12 = sshll.u32 %s230_s11, 4  ;;  %p1298_p5 = pnand %p871_p3, %p1275_p12  ;;  %s239_s12 = int_to_ptr.vmem [resolvable:$true] %s238_s12 }
  0x2c   : > { %s227_s1 = scalar_lea.sflag [#allocation3], %s226_s17  ;;  %s999_s16 = scalar_lea.vmem %s239_s12, 64 }
  0x2d   : > { %p988_p7 = pneg %p1298_p5  ;;  %p1000_p2 = scmp.ne.s32.totalorder %s239_s12, %s999_s16 }
  0x2e   : > { %s1159_s13 = smov [#allocation2]  }
  0x2f   : > { %p1002_p6 = pnand %p1000_p2, %p988_p7  ;;  %s1004_s7 = sshll.u32 %s1159_s13, 4  ;;  %s1005_s7 = int_to_ptr.vmem [resolvable:$false] %s1004_s7 }
  0x30   : > { %s1006_s6 = scalar_lea.vmem %s1005_s7, 128  ;;  %p1007_p13 = scmp.lt.s32.totalorder %s239_s12, %s1005_s7 }
  0x31   : > { %p1003_p9 = pneg %p1002_p6  ;;  %p1008_p11 = scmp.lt.s32.totalorder %s1006_s6, %s999_s16 }
  0x33   : > { %p1009_p10 = por %p1008_p11, %p1007_p13 }
  0x35   : > { %p1010_p1 = pnand %p1009_p10, %p1003_p9 }
  0x37   : > { %1013 = shalt.err (!%p1010_p1)
}
  0x38   : > { %859 = dma.hbm_to_vmem [thread:$0]  (!%p1298_p5), %s236_s10, 64, %s239_s12, %s227_s1  }
  0x39   : > { %247 = sbr.rel (%p1248_p8) target bundleno = 360 (0x168), region = 32  ;;  %s1309_s14 = sand.u32 (!%p1248_p8), 1, %s1138_s19  }
  0x3a   : > { %s1312_s17 = sshll.u32 (!%p1248_p8), %s1309_s14, 2  ;;  %s250_s7 = scalar_lea.sflag (!%p1248_p8), [#allocation3], %s1309_s14 }
  0x3b   : > { %s253_s29 = scalar_lea.vmem (!%p1248_p8), [#allocation2], %s1312_s17 }
  0x3e   : > { %1117 = dma.done.wait (%p1238_p4), %s250_s7, 64  }
  0x3f   : > { %1119 = vsyncadd (%p1238_p4), %s250_s7, 4294967232  ;;  %p1472_p1 = scmp.eq.s32.totalorder %s1227_s24, 0 }
  0x41   : > { %1121 = dma.done.wait (%p1472_p1), [#allocation6], 3072   ;;  %p1473_p8 = pmov %p1472_p1 }
  0x42   : > { %v1160_v0 = vmov 0.0   ;;  %vm1161_vm0 = vmmov 0   ;;  %v1162_v1 = vmov 0   ;;  %v928_v2 = vld [vmem:[#allocation5 + $0xac] ss:$12 sps:$4 sm:$0xff]   ;;  %v330_v27 = vlaneseq  ;;  %s806_s28 = sshll.u32 %s1146_s21, 6 }
  0x43   : > { %1123 = vsyncadd (%p1473_p8), [#allocation6], 4294964224  ;;  %820 = vmatprep.subr.bf16.mxu1 %v1160_v0  ;;  %836 = vmatprep.mubr.msk.bf16.mxu1 %vm1161_vm0, %v1160_v0  ;;  %v930_v3 = vld [vmem:[#allocation5 + $0xb0] ss:$12 sps:$4 sm:$0xff]   ;;  %v931_v4 = vld [vmem:[#allocation5 + $0xa8] ss:$12 sps:$4 sm:$0xff]   ;;  %s1339_s21 = scalar_lea.hbm %s1454_s3, %s806_s28  ;;  %s1346_s1 = scalar_lea.hbm %s1455_s4, %s806_s28 }
  0x44   : > { %505 = vmatprep.mubr.bf16.mxu0 %v1162_v1  ;;  %473 = vmatprep.subr.bf16.mxu0 %v928_v2  ;;  %v932_v5 = vld [vmem:[#allocation5 + $0x94] ss:$12 sps:$4 sm:$0xff]   ;;  %v934_v6 = vld [vmem:[#allocation5 + $0x98] ss:$12 sps:$4 sm:$0xff]   ;;  %v935_v7 = vld [vmem:[#allocation5 + $0x90] ss:$12 sps:$4 sm:$0xff]   ;;  %s1353_s6 = scalar_lea.hbm %s1456_s5, %s806_s28 }
  0x45   : > { %821 = vmatpush3.bf16.msra.mxu1 %v930_v3  ;;  %474 = vmatpush1.bf16.msra.mxu0 %v931_v4  ;;  %v936_v8 = vld [vmem:[#allocation5 + $0x7c] ss:$12 sps:$4 sm:$0xff]   ;;  %v938_v9 = vld [vmem:[#allocation5 + $0x80] ss:$12 sps:$4 sm:$0xff]   ;;  %v939_v10 = vld [vmem:[#allocation5 + $0x78] ss:$12 sps:$4 sm:$0xff]  }
  0x46   : > { %822 = vmatprep.subr.bf16.mxu1 %v1160_v0  ;;  %475 = vmatprep.subr.bf16.mxu0 %v932_v5  ;;  %v940_v11 = vld [vmem:[#allocation5 + $0x64] ss:$12 sps:$4 sm:$0xff]   ;;  %v942_v12 = vld [vmem:[#allocation5 + $0x68] ss:$12 sps:$4 sm:$0xff]   ;;  %v943_v13 = vld [vmem:[#allocation5 + $0x60] ss:$12 sps:$4 sm:$0xff]  }
  0x47   : > { %v944_v14 = vld [vmem:[#allocation5 + $0x4c] ss:$12 sps:$4 sm:$0xff]   ;;  %v946_v15 = vld [vmem:[#allocation5 + $0x50] ss:$12 sps:$4 sm:$0xff]   ;;  %v947_v16 = vld [vmem:[#allocation5 + $0x48] ss:$12 sps:$4 sm:$0xff]  }
  0x48   : > { %v948_v17 = vld [vmem:[#allocation5 + $0x34] ss:$12 sps:$4 sm:$0xff]   ;;  %v950_v18 = vld [vmem:[#allocation5 + $0x38] ss:$12 sps:$4 sm:$0xff]   ;;  %v951_v19 = vld [vmem:[#allocation5 + $0x30] ss:$12 sps:$4 sm:$0xff]  }
  0x49   : > { %823 = vmatpush3.bf16.msra.mxu1 %v934_v6  ;;  %476 = vmatpush1.bf16.msra.mxu0 %v935_v7  ;;  %v952_v20 = vld [vmem:[#allocation5 + $0x1c] ss:$12 sps:$4 sm:$0xff]   ;;  %v954_v21 = vld [vmem:[#allocation5 + $0x20] ss:$12 sps:$4 sm:$0xff]   ;;  %v955_v22 = vld [vmem:[#allocation5 + $0x18] ss:$12 sps:$4 sm:$0xff]  }
  0x4a   : > { %824 = vmatprep.subr.bf16.mxu1 %v1160_v0  ;;  %477 = vmatprep.subr.bf16.mxu0 %v936_v8  ;;  %v956_v23 = vld [vmem:[#allocation5 + $0x4] ss:$12 sps:$4 sm:$0xff]   ;;  %v958_v24 = vld [vmem:[#allocation5 + $0x8] ss:$12 sps:$4 sm:$0xff]   ;;  %v959_v25 = vld [vmem:[#allocation5] ss:$12 sps:$4 sm:$0xff]  }
  0x4b   : > { %v295_v26 = vld [vmem:[%s253_s29] sm:$0xf]  ;;  %v331_v28 = vshrl.u32 %v330_v27, 7  ;;  %s279_s8 = scalar_lea.vmem [#allocation7], %s1312_s17  ;;  %s1460_s10 = scalar_lea.vmem [#allocation8], %s1312_s17 }
  0x4c   : > { %v328_v31 = vld [vmem:[%s1453_s2] sm:$0x7]  ;;  %s585_s9 = sshll.u32 %s279_s8, 4  ;;  %s599_s11 = sshll.u32 %s1460_s10, 4  ;;  %s1341_s9 = int_to_ptr.vmem [resolvable:$true] %s585_s9  ;;  %s1348_s11 = int_to_ptr.vmem [resolvable:$true] %s599_s11 }
  0x4d   : > { %825 = vmatpush3.bf16.msra.mxu1 %v938_v9  ;;  %478 = vmatpush1.bf16.msra.mxu0 %v939_v10  ;;  %v340_v29 = vsub.s32 2, %v331_v28  ;;  %v332_v30 = vsub.s32 0, %v331_v28  ;;  %v336_v32 = vsub.s32 1, %v331_v28  ;;  %s293_s12 = scalar_lea.vmem [#allocation10], %s1312_s17  ;;  %s1014_s26 = scalar_lea.vmem %s1341_s9, 64 }
  0x4e   : > { %826 = vmatprep.subr.bf16.mxu1 %v1160_v0  ;;  %479 = vmatprep.subr.bf16.mxu0 %v940_v11  ;;  %s613_s16 = sshll.u32 %s293_s12, 4  ;;  %p1015_p4 = scmp.ne.s32.totalorder %s1341_s9, %s1014_s26  ;;  %s1355_s16 = int_to_ptr.vmem [resolvable:$true] %s613_s16 }
  0x4f   : > { %v341_v33 = vrot.slane %v328_v31, %v340_v29  ;;  %v333_v34 = vrot.slane %v328_v31, %v332_v30  ;;  %v337_v36 = vrot.slane %v328_v31, %v336_v32  ;;  %s1163_s7 = smov [#allocation7]  }
  0x50   : > { %p1016_p10 = pnand %p1015_p4, %p1281_p0  ;;  %s1018_s29 = sshll.u32 %s1163_s7, 4  ;;  %s1019_s29 = int_to_ptr.vmem [resolvable:$false] %s1018_s29 }
  0x51   : > { %827 = vmatpush3.bf16.msra.mxu1 %v942_v12  ;;  %480 = vmatpush1.bf16.msra.mxu0 %v943_v13  ;;  %p1021_p3 = scmp.lt.s32.totalorder %s1341_s9, %s1019_s29 }
  0x52   : > { %828 = vmatprep.subr.bf16.mxu1 %v1160_v0  ;;  %481 = vmatprep.subr.bf16.mxu0 %v944_v14  ;;  %p1017_p12 = pneg %p1016_p10 }
  0x55   : > { %829 = vmatpush3.bf16.msra.mxu1 %v946_v15  ;;  %482 = vmatpush1.bf16.msra.mxu0 %v947_v16 }
  0x56   : > { %830 = vmatprep.subr.bf16.mxu1 %v1160_v0  ;;  %483 = vmatprep.subr.bf16.mxu0 %v948_v17 }
  0x59   : > { %831 = vmatpush3.bf16.msra.mxu1 %v950_v18  ;;  %484 = vmatpush1.bf16.msra.mxu0 %v951_v19 }
  0x5a   : > { %832 = vmatprep.subr.bf16.mxu1 %v1160_v0  ;;  %485 = vmatprep.subr.bf16.mxu0 %v952_v20 }
  0x5d   : > { %833 = vmatpush3.bf16.msra.mxu1 %v954_v21  ;;  %486 = vmatpush1.bf16.msra.mxu0 %v955_v22 }
  0x5e   : > { %834 = vmatprep.subr.bf16.mxu1 %v1160_v0  ;;  %487 = vmatprep.subr.bf16.mxu0 %v956_v23 }
  0x61   : > { %835 = vmatpush3.bf16.msra.mxu1 %v958_v24  ;;  %488 = vmatpush1.bf16.msra.mxu0 %v959_v25 }
  0x64   : > { %837 = vmatmul.mubr.bf16.vlgmr.msra.gmra.mxu1 %v295_v26  ;;  %506 = vmatmul.mubr.bf16.vlgmr.msra.gmra.mxu0 %v295_v26 }
 0x124   : > { %v548_v35 = vpop.f32.mrf.mxu1  ;;  %v507_v38 = vpop.f32.mrf.mxu0 }
 0x125   : > { %v549_v37 = vadd.f32 %v548_v35, %v341_v33  ;;  %v508_v39 = vadd.f32 %v507_v38, %v333_v34 }
 0x126   : > { %v838_v40 = vpop.f32.mrf.mxu1  ;;  %v509_v42 = vpop.f32.mrf.mxu0 }
 0x127   : > { %v558_v41 = vpack.c.bf16 %v549_v37, %v549_v37  ;;  %v554_v43 = vpack.c.bf16 %v508_v39, %v508_v39  ;;  %v510_v44 = vadd.f32 %v509_v42, %v337_v36 }
 0x128   : > { %v551_v45 = vpop.f32.mrf.mxu1  ;;  %v511_v46 = vpop.f32.mrf.mxu0 }
 0x129   : > { %559 = vst [vmem:[%s293_s12] sm:$0xf] %v558_v41  ;;  %555 = vst [vmem:[%s279_s8] sm:$0xf] %v554_v43  ;;  %v556_v47 = vpack.c.bf16 %v510_v44, %v510_v44  ;;  %s561_s12 = scalar_lea.sflag [#allocation4], %s1309_s14  ;;  %s1020_s8 = scalar_lea.vmem %s1019_s29, 128 }
 0x12a   : > { %v839_v48 = vpop.f32.mrf.mxu1  ;;  %v512_v49 = vpop.f32.mrf.mxu0  ;;  %p1022_p5 = scmp.lt.s32.totalorder %s1020_s8, %s1014_s26 }
 0x12c   : > { %p1023_p7 = por %p1022_p5, %p1021_p3 }
 0x12e   : > { %p1024_p2 = pnand %p1023_p7, %p1017_p12 }
 0x130   : > { %1027 = shalt.err (!%p1024_p2)
}
 0x131   : > { %s1028_s28 = scalar_lea.hbm %s1339_s21, 64  ;;  %s1032_s13 = scalar_lea.hbm %s1454_s3, 128 }
 0x132   : > { %p1029_p6 = scmp.ne.s32.totalorder %s1339_s21, %s1028_s28  ;;  %p1033_p11 = scmp.lt.s32.totalorder %s1339_s21, %s1454_s3 }
 0x133   : > { %p1034_p1 = scmp.lt.s32.totalorder %s1032_s13, %s1028_s28 }
 0x134   : > { %p1030_p9 = pnand %p1029_p6, %p1281_p0 }
 0x135   : > { %p1035_p8 = por %p1034_p1, %p1033_p11 }
 0x136   : > { %p1031_p13 = pneg %p1030_p9 }
 0x138   : > { %p1036_p4 = pnand %p1035_p8, %p1031_p13 }
 0x13a   : > { %1039 = shalt.err (!%p1036_p4)
}
 0x13b   : > { %846 = dma.vmem_to_hbm [thread:$0]  (%p1281_p0), %s1341_s9, 64, %s1339_s21, %s561_s12  }
 0x13c   : > { %s1474_s26 = scalar_lea.vmem [#allocation8], %s1312_s17  ;;  %s1475_s29 = sand.u32 1, %s1227_s24  }
 0x13d   : > { %557 = vst [vmem:[%s1474_s26] sm:$0xf] %v556_v47  ;;  %s1382_s10 = scalar_lea.sflag [#allocation9], %s1475_s29  ;;  %s1040_s8 = scalar_lea.vmem %s1348_s11, 64 }
 0x13e   : > { %p1041_p10 = scmp.ne.s32.totalorder %s1348_s11, %s1040_s8  ;;  %s1164_s28 = smov [#allocation8]  }
 0x13f   : > { %s1044_s14 = sshll.u32 %s1164_s28, 4  ;;  %s1045_s14 = int_to_ptr.vmem [resolvable:$false] %s1044_s14 }
 0x140   : > { %p1042_p12 = pnand %p1041_p10, %p1281_p0  ;;  %s1046_s25 = scalar_lea.vmem %s1045_s14, 128 }
 0x141   : > { %p1047_p5 = scmp.lt.s32.totalorder %s1348_s11, %s1045_s14  ;;  %p1048_p7 = scmp.lt.s32.totalorder %s1046_s25, %s1040_s8 }
 0x142   : > { %p1043_p3 = pneg %p1042_p12 }
 0x143   : > { %p1049_p2 = por %p1048_p7, %p1047_p5 }
 0x145   : > { %p1050_p6 = pnand %p1049_p2, %p1043_p3 }
 0x147   : > { %1053 = shalt.err (!%p1050_p6)
}
 0x148   : > { %s1054_s24 = scalar_lea.hbm %s1346_s1, 64  ;;  %s1058_s21 = scalar_lea.hbm %s1455_s4, 128 }
 0x149   : > { %p1055_p9 = scmp.ne.s32.totalorder %s1346_s1, %s1054_s24  ;;  %p1059_p1 = scmp.lt.s32.totalorder %s1346_s1, %s1455_s4 }
 0x14a   : > { %p1060_p8 = scmp.lt.s32.totalorder %s1058_s21, %s1054_s24 }
 0x14b   : > { %p1056_p13 = pnand %p1055_p9, %p1281_p0 }
 0x14c   : > { %p1061_p4 = por %p1060_p8, %p1059_p1 }
 0x14d   : > { %p1057_p11 = pneg %p1056_p13 }
 0x14f   : > { %p1062_p10 = pnand %p1061_p4, %p1057_p11 }
 0x151   : > { %1065 = shalt.err (!%p1062_p10)
}
 0x152   : > { %847 = dma.vmem_to_hbm [thread:$0]  (%p1281_p0), %s1348_s11, 64, %s1346_s1, %s1382_s10  }
 0x153   : > { %s1066_s7 = scalar_lea.vmem %s1355_s16, 64  ;;  %s1165_s26 = smov [#allocation10]  }
 0x154   : > { %p1067_p12 = scmp.ne.s32.totalorder %s1355_s16, %s1066_s7  ;;  %s1070_s29 = sshll.u32 %s1165_s26, 4  ;;  %s1071_s29 = int_to_ptr.vmem [resolvable:$false] %s1070_s29 }
 0x155   : > { %s1072_s8 = scalar_lea.vmem %s1071_s29, 128  ;;  %p1073_p7 = scmp.lt.s32.totalorder %s1355_s16, %s1071_s29 }
 0x156   : > { %p1068_p3 = pnand %p1067_p12, %p1281_p0  ;;  %p1074_p2 = scmp.lt.s32.totalorder %s1072_s8, %s1066_s7 }
 0x158   : > { %p1069_p5 = pneg %p1068_p3  ;;  %p1075_p6 = por %p1074_p2, %p1073_p7 }
 0x15a   : > { %p1076_p9 = pnand %p1075_p6, %p1069_p5 }
 0x15c   : > { %1079 = shalt.err (!%p1076_p9)
}
 0x15d   : > { %s1080_s28 = scalar_lea.hbm %s1353_s6, 64  ;;  %s1084_s14 = scalar_lea.hbm %s1456_s5, 128 }
 0x15e   : > { %p1081_p13 = scmp.ne.s32.totalorder %s1353_s6, %s1080_s28  ;;  %p1085_p8 = scmp.lt.s32.totalorder %s1353_s6, %s1456_s5 }
 0x15f   : > { %p1086_p4 = scmp.lt.s32.totalorder %s1084_s14, %s1080_s28 }
 0x160   : > { %p1082_p11 = pnand %p1081_p13, %p1281_p0 }
 0x161   : > { %p1087_p10 = por %p1086_p4, %p1085_p8 }
 0x162   : > { %p1083_p1 = pneg %p1082_p11 }
 0x164   : > { %p1088_p12 = pnand %p1087_p10, %p1083_p1 }
 0x166   : > { %1091 = shalt.err (!%p1088_p12)
}
 0x167   : > { %848 = dma.vmem_to_hbm [thread:$0]  (%p1281_p0), %s1355_s16, 64, %s1353_s6, %s1382_s10  }
 0x168 PF: > { %s625_s17 = sand.u32 1, %s1134_s18   ;;  %p1476_p3 = scmp.ne.s32.totalorder %s1463_s27, 0 }
 0x169   : > { %p1477_p5 = scmp.ge.s32.totalorder %s1154_s23, 2  ;;  %s626_s9 = scalar_lea.sflag [#allocation4], %s625_s17 }
 0x16b   : > { %p861_p7 = pnand %p1477_p5, %p1476_p3 }
 0x16d   : > { %p862_p2 = pneg %p861_p7 }
 0x16f   : > { %1125 = dma.done.wait (%p862_p2), %s626_s9, 64  }
 0x170   : > { %1127 = vsyncadd (%p862_p2), %s626_s9, 4294967232  ;;  %s1478_s21 = sadd.s32 4294967294, %s1154_s23  }
 0x171   : > { %s634_s12 = sand.u32 1, %s1478_s21  }
 0x172   : > { %s635_s15 = scalar_lea.sflag [#allocation9], %s634_s12 }
 0x173   : > { %1129 = dma.done.wait (%p862_p2), %s635_s15, 128  }
 0x174   : > { %1131 = vsyncadd (%p862_p2), %s635_s15, 4294967168  ;;  %s26_s23 = sadd.s32 1, %s1154_s23   ;;  %s1479_s27 = sld [smem:[#allocation15_spill]] }
 0x175   : > { %p23_p0 = scmp.ge.s32.totalorder %s26_s23, 4   ;;  %s1480_s18 = smov %s1138_s19 }
 0x176   : > { %s1481_s19 = smov %s1142_s20  ;;  %s1482_s20 = smov %s1290_s30 }
 0x177   : > { %s1483_s21 = smov %s1150_s22  ;;  %25 = sbr.rel (!%p23_p0) target bundleno = 11 (0xb), region = 113 }
 0x17a   : > { %s1484_s22 = smov %s1479_s27 }
 0x17c   :  { %649 = vsyncpa [#allocation3], 1 }
 0x17d   :  { %651 = vsyncpa [#allocation3 + $0x1], 1 }
 0x17e   :  { %652 = vsyncpa [#allocation6], 1 }
 0x17f   :  { %653 = vsyncpa [#allocation4], 1 }
 0x180   :  { %655 = vsyncpa [#allocation4 + $0x1], 1 }
 0x181   :  { %656 = vsyncpa [#allocation9], 1 }
 0x182   :  { %658 = vsyncpa [#allocation9 + $0x1], 1 }

</bundles_post_ra>
